<compile_context>
chip_gen: v5e
topology: v5e:2x2
jax: 0.10.0
libtpu: 0.0.40
codegen_flags: <defaults>
</compile_context>

<pallas_src>
import functools

import jax
import jax.numpy as jnp
from jax.experimental import pallas as pl
from jax.experimental.pallas import tpu as pltpu

HIDDEN = 256
LANE = 128
# Largest batch block run as a single grid step; bigger batches use 512-row
# blocks (multiple of 256) and rely on dimension_semantics=("parallel",).
MAX_SINGLE_BLOCK = 1024
MULTI_BLOCK = 512


def _round_up(n: int, m: int) -> int:
    return ((n + m - 1) // m) * m


def _pad_axis(a, axis, size):
    pad = size - a.shape[axis]
    if pad <= 0:
        return a
    widths = [(0, 0)] * a.ndim
    widths[axis] = (0, pad)
    return jnp.pad(a, widths)


def _dqn_kernel(x_ref, w1_ref, b1_ref, w2_ref, b2_ref, w3_ref, b3_ref, out_ref):
    # fc1 + relu  (bf16 operands, f32 accumulate, f32 elementwise)
    h1 = jnp.dot(x_ref[...], w1_ref[...], preferred_element_type=jnp.float32)
    h1 = jnp.maximum(h1 + b1_ref[...], 0.0)
    # fc2 + relu
    h2 = jnp.dot(h1.astype(jnp.bfloat16), w2_ref[...],
                 preferred_element_type=jnp.float32)
    h2 = jnp.maximum(h2 + b2_ref[...], 0.0)
    # fc3 (no activation); bias add on the lane-dense padded 128-wide tile.
    out = jnp.dot(h2.astype(jnp.bfloat16), w3_ref[...],
                  preferred_element_type=jnp.float32)
    out_ref[...] = (out + b3_ref[...]).astype(out_ref.dtype)


def prepare_dqn_params(w1, b1, w2, b2, w3, b3):
    """Pre-bake kernel-layout parameters ONCE (init / target-net sync).

    Weights are (in, out) = PyTorch W.T. Output dim of fc3 is zero-padded to a
    multiple of 128 (lane-dense); weights cast to bf16, biases kept f32.
    """
    n_actions = w3.shape[1]
    n_pad = _round_up(max(n_actions, LANE), LANE)
    return (
        w1.astype(jnp.bfloat16),                                   # (n_obs, 256)
        jnp.asarray(b1, jnp.float32).reshape(1, -1),               # (1, 256)
        w2.astype(jnp.bfloat16),                                   # (256, 256)
        jnp.asarray(b2, jnp.float32).reshape(1, -1),               # (1, 256)
        _pad_axis(w3, 1, n_pad).astype(jnp.bfloat16),              # (256, n_pad)
        _pad_axis(jnp.asarray(b3, jnp.float32).reshape(1, -1), 1, n_pad),
    )


@functools.partial(jax.jit, static_argnames=("n_actions",))
def dqn_forward(x, w1, b1, w2, b2, w3, b3, *, n_actions):
    """DQN forward pass. `x` is (B, n_obs) f32; weights/biases come from
    prepare_dqn_params (already padded/cast)."""
    B, n_obs = x.shape
    h = HIDDEN
    n_pad = w3.shape[1]

    # Batch tiling: single grid step for typical DQN batches; 512-row blocks
    # only for very large B (then megacore / multi-step pipelining pays off).
    b16 = _round_up(B, 16)            # bf16 packs two rows per sublane
    if b16 <= MAX_SINGLE_BLOCK:
        tb = b16
    else:
        tb = MULTI_BLOCK
    b_pad = _round_up(b16, tb)
    grid = (b_pad // tb,)

    # Only x is touched per call: pad batch rows (usually a no-op) + bf16 cast.
    xk = _pad_axis(x, 0, b_pad).astype(jnp.bfloat16)

    const = lambda shape: pl.BlockSpec(shape, lambda i: (0, 0))

    flops = 2 * b_pad * (n_obs * h + h * h + h * n_pad)
    bytes_accessed = (
        b_pad * n_obs * 2                                 # x (bf16)
        + (n_obs * h + h * h + h * n_pad) * 2             # weights (bf16)
        + (h + h + n_pad) * 4                             # biases (f32)
        + b_pad * n_pad * 4                               # output (f32)
    )

    out_padded = pl.pallas_call(
        _dqn_kernel,
        out_shape=jax.ShapeDtypeStruct((b_pad, n_pad), jnp.float32),
        grid=grid,
        in_specs=[
            # x: batch-blocked; last dim equals the full array dim (no K pad).
            pl.BlockSpec((tb, n_obs), lambda i: (i, 0)),
            const((n_obs, h)), const((1, h)),     # w1, b1 (VMEM-resident)
            const((h, h)), const((1, h)),         # w2, b2
            const((h, n_pad)), const((1, n_pad)), # w3, b3
        ],
        out_specs=pl.BlockSpec((tb, n_pad), lambda i: (i, 0)),
        compiler_params=pltpu.CompilerParams(
            dimension_semantics=("parallel",),
        ),
        cost_estimate=pl.CostEstimate(
            flops=flops, transcendentals=0, bytes_accessed=bytes_accessed),
    )(xk, w1, b1, w2, b2, w3, b3)

    # Slice the lane-dense padded output back to the true (B, n_actions).
    return out_padded[:B, :n_actions]


def init_dqn_params(key, n_observations, n_actions):
    """Deterministic init mimicking PyTorch nn.Linear default:
    U(-1/sqrt(fan_in), 1/sqrt(fan_in)) for both weight and bias.
    Weights stored in (in, out) layout (PyTorch W.T)."""
    def linear(key, fan_in, fan_out):
        kw, kb = jax.random.split(key)
        bound = 1.0 / jnp.sqrt(jnp.float32(fan_in))
        w = jax.random.uniform(kw, (fan_in, fan_out), jnp.float32, -bound, bound)
        b = jax.random.uniform(kb, (1, fan_out), jnp.float32, -bound, bound)
        return w, b

    k1, k2, k3 = jax.random.split(key, 3)
    w1, b1 = linear(k1, n_observations, HIDDEN)
    w2, b2 = linear(k2, HIDDEN, HIDDEN)
    w3, b3 = linear(k3, HIDDEN, n_actions)
    return w1, b1, w2, b2, w3, b3


def reference_forward_f32(x, w1, b1, w2, b2, w3, b3):
    h = jnp.maximum(x @ w1 + b1, 0.0)
    h = jnp.maximum(h @ w2 + b2, 0.0)
    return h @ w3 + b3


def reference_forward_bf16(x, w1, b1, w2, b2, w3, b3):
    """Same bf16-operand / f32-accumulate recipe as the kernel."""
    bf = jnp.bfloat16
    h = jnp.dot(x.astype(bf), w1.astype(bf), preferred_element_type=jnp.float32)
    h = jnp.maximum(h + b1, 0.0)
    h = jnp.dot(h.astype(bf), w2.astype(bf), preferred_element_type=jnp.float32)
    h = jnp.maximum(h + b2, 0.0)
    return jnp.dot(h.astype(bf), w3.astype(bf),
                   preferred_element_type=jnp.float32) + b3


if __name__ == "__main__":
    key = jax.random.PRNGKey(0)
    k_x, k_p = jax.random.split(key)

    B = 8                # batch of observations
    n_observations = 32  # small observation vector
    n_actions = 8        # small discrete action space

    x = jax.random.normal(k_x, (B, n_observations), dtype=jnp.float32)
    params = init_dqn_params(k_p, n_observations, n_actions)

    # Pre-bake kernel-layout params once (as the training loop would at init /
    # target-net sync), then run the kernel on fresh observations.
    kparams = prepare_dqn_params(*params)
    out = dqn_forward(x, *kparams, n_actions=n_actions)
    out = jax.block_until_ready(out)
    assert out.shape == (B, n_actions)

    # Exact-recipe (bf16 operands, f32 accumulate) reference: should be tight.
    ref_bf16 = reference_forward_bf16(x, *params)
    assert jnp.allclose(out, ref_bf16, atol=2e-2, rtol=2e-2)

    # Full-f32 reference: loose check (kernel intentionally uses bf16 matmuls).
    ref_f32 = reference_forward_f32(x, *params)
    assert jnp.allclose(out, ref_f32, atol=5e-2, rtol=5e-2)

    print("KERNEL_OK")
</pallas_src>

<mosaic_0001>
module attributes {stable_mosaic.version = 11 : i64} {
  func.func @_dqn_kernel(%arg0: i32, %arg1: memref<16x32xbf16, #tpu.memory_space<vmem>>, %arg2: memref<32x256xbf16, #tpu.memory_space<vmem>>, %arg3: memref<1x256xf32, #tpu.memory_space<vmem>>, %arg4: memref<256x256xbf16, #tpu.memory_space<vmem>>, %arg5: memref<1x256xf32, #tpu.memory_space<vmem>>, %arg6: memref<256x128xbf16, #tpu.memory_space<vmem>>, %arg7: memref<1x128xf32, #tpu.memory_space<vmem>>, %arg8: memref<16x128xf32, #tpu.memory_space<vmem>>) attributes {dimension_semantics = [#tpu.dimension_semantics<parallel>], iteration_bounds = array<i64: 1>, scalar_prefetch = 0 : i64, scratch_operands = 0 : i64, tpu.core_type = #tpu.core_type<tc>, window_params = [{transform_indices = @transform_0, window_bounds = array<i64: 16, 32>}, {pipeline_mode = #tpu.pipeline_mode<synchronous>, transform_indices = @transform_1, window_bounds = array<i64: 32, 256>}, {pipeline_mode = #tpu.pipeline_mode<synchronous>, transform_indices = @transform_2, window_bounds = array<i64: 1, 256>}, {pipeline_mode = #tpu.pipeline_mode<synchronous>, transform_indices = @transform_3, window_bounds = array<i64: 256, 256>}, {pipeline_mode = #tpu.pipeline_mode<synchronous>, transform_indices = @transform_4, window_bounds = array<i64: 1, 256>}, {pipeline_mode = #tpu.pipeline_mode<synchronous>, transform_indices = @transform_5, window_bounds = array<i64: 256, 128>}, {pipeline_mode = #tpu.pipeline_mode<synchronous>, transform_indices = @transform_6, window_bounds = array<i64: 1, 128>}, {transform_indices = @transform_7, window_bounds = array<i64: 16, 128>}]} {
    %c0 = arith.constant 0 : index
    %c0_0 = arith.constant 0 : index
    %0 = vector.load %arg1[%c0, %c0_0] : memref<16x32xbf16, #tpu.memory_space<vmem>>, vector<16x32xbf16>
    %c0_1 = arith.constant 0 : index
    %c0_2 = arith.constant 0 : index
    %1 = vector.load %arg2[%c0_1, %c0_2] : memref<32x256xbf16, #tpu.memory_space<vmem>>, vector<32x256xbf16>
    %cst = arith.constant dense<0.000000e+00> : vector<16x256xf32>
    %2 = tpu.matmul %0, %1, %cst {dimension_numbers = #tpu.dot_dimension_numbers<[1], [0], [0], [1], [0, 0, 1, 1], [], []>} : vector<16x32xbf16>, vector<32x256xbf16>, vector<16x256xf32> -> vector<16x256xf32>
    %c0_3 = arith.constant 0 : index
    %c0_4 = arith.constant 0 : index
    %3 = vector.load %arg3[%c0_3, %c0_4] : memref<1x256xf32, #tpu.memory_space<vmem>>, vector<1x256xf32>
    %4 = vector.broadcast %3 : vector<1x256xf32> to vector<16x256xf32>
    %5 = arith.addf %2, %4 : vector<16x256xf32>
    %cst_5 = arith.constant 0.000000e+00 : f32
    %6 = vector.broadcast %cst_5 : f32 to vector<16x256xf32>
    %7 = arith.maximumf %5, %6 : vector<16x256xf32>
    %8 = arith.truncf %7 : vector<16x256xf32> to vector<16x256xbf16>
    %c0_6 = arith.constant 0 : index
    %c0_7 = arith.constant 0 : index
    %9 = vector.load %arg4[%c0_6, %c0_7] : memref<256x256xbf16, #tpu.memory_space<vmem>>, vector<256x256xbf16>
    %cst_8 = arith.constant dense<0.000000e+00> : vector<16x256xf32>
    %10 = tpu.matmul %8, %9, %cst_8 {dimension_numbers = #tpu.dot_dimension_numbers<[1], [0], [0], [1], [0, 0, 1, 1], [], []>} : vector<16x256xbf16>, vector<256x256xbf16>, vector<16x256xf32> -> vector<16x256xf32>
    %c0_9 = arith.constant 0 : index
    %c0_10 = arith.constant 0 : index
    %11 = vector.load %arg5[%c0_9, %c0_10] : memref<1x256xf32, #tpu.memory_space<vmem>>, vector<1x256xf32>
    %12 = vector.broadcast %11 : vector<1x256xf32> to vector<16x256xf32>
    %13 = arith.addf %10, %12 : vector<16x256xf32>
    %cst_11 = arith.constant 0.000000e+00 : f32
    %14 = vector.broadcast %cst_11 : f32 to vector<16x256xf32>
    %15 = arith.maximumf %13, %14 : vector<16x256xf32>
    %16 = arith.truncf %15 : vector<16x256xf32> to vector<16x256xbf16>
    %c0_12 = arith.constant 0 : index
    %c0_13 = arith.constant 0 : index
    %17 = vector.load %arg6[%c0_12, %c0_13] : memref<256x128xbf16, #tpu.memory_space<vmem>>, vector<256x128xbf16>
    %cst_14 = arith.constant dense<0.000000e+00> : vector<16x128xf32>
    %18 = tpu.matmul %16, %17, %cst_14 {dimension_numbers = #tpu.dot_dimension_numbers<[1], [0], [0], [1], [0, 0, 1, 1], [], []>} : vector<16x256xbf16>, vector<256x128xbf16>, vector<16x128xf32> -> vector<16x128xf32>
    %c0_15 = arith.constant 0 : index
    %c0_16 = arith.constant 0 : index
    %19 = vector.load %arg7[%c0_15, %c0_16] : memref<1x128xf32, #tpu.memory_space<vmem>>, vector<1x128xf32>
    %20 = vector.broadcast %19 : vector<1x128xf32> to vector<16x128xf32>
    %21 = arith.addf %18, %20 : vector<16x128xf32>
    %c0_17 = arith.constant 0 : index
    %c0_18 = arith.constant 0 : index
    %22 = vector.load %arg8[%c0_17, %c0_18] : memref<16x128xf32, #tpu.memory_space<vmem>>, vector<16x128xf32>
    tpu.vector_store %arg8[%c0_17, %c0_18], %21 {strides = array<i32>} : memref<16x128xf32, #tpu.memory_space<vmem>>, vector<16x128xf32>,
    return
  }
  func.func @transform_0(%arg0: i32) -> (i32, i32) {
    %c0_i32 = arith.constant 0 : i32
    %c0_i32_0 = arith.constant 0 : i32
    return %arg0, %c0_i32 : i32, i32
  }
  func.func @transform_1(%arg0: i32) -> (i32, i32) {
    %c0_i32 = arith.constant 0 : i32
    %c0_i32_0 = arith.constant 0 : i32
    %c0_i32_1 = arith.constant 0 : i32
    return %c0_i32, %c0_i32_0 : i32, i32
  }
  func.func @transform_2(%arg0: i32) -> (i32, i32) {
    %c0_i32 = arith.constant 0 : i32
    %c0_i32_0 = arith.constant 0 : i32
    %c0_i32_1 = arith.constant 0 : i32
    return %c0_i32, %c0_i32_0 : i32, i32
  }
  func.func @transform_3(%arg0: i32) -> (i32, i32) {
    %c0_i32 = arith.constant 0 : i32
    %c0_i32_0 = arith.constant 0 : i32
    %c0_i32_1 = arith.constant 0 : i32
    return %c0_i32, %c0_i32_0 : i32, i32
  }
  func.func @transform_4(%arg0: i32) -> (i32, i32) {
    %c0_i32 = arith.constant 0 : i32
    %c0_i32_0 = arith.constant 0 : i32
    %c0_i32_1 = arith.constant 0 : i32
    return %c0_i32, %c0_i32_0 : i32, i32
  }
  func.func @transform_5(%arg0: i32) -> (i32, i32) {
    %c0_i32 = arith.constant 0 : i32
    %c0_i32_0 = arith.constant 0 : i32
    %c0_i32_1 = arith.constant 0 : i32
    return %c0_i32, %c0_i32_0 : i32, i32
  }
  func.func @transform_6(%arg0: i32) -> (i32, i32) {
    %c0_i32 = arith.constant 0 : i32
    %c0_i32_0 = arith.constant 0 : i32
    %c0_i32_1 = arith.constant 0 : i32
    return %c0_i32, %c0_i32_0 : i32, i32
  }
  func.func @transform_7(%arg0: i32) -> (i32, i32) {
    %c0_i32 = arith.constant 0 : i32
    %c0_i32_0 = arith.constant 0 : i32
    return %arg0, %c0_i32 : i32, i32
  }
}

</mosaic_0001>

<bundles_post_ra>
// kernel: dqn_forward.1
= control target key start
LH: loop header
LB: loop body
LE: loop exit
PB: predicated region body
PF: predicated region fallthrough
CT: control target
= control target key end

     0   :  { %12 = vsyncpa [#allocation3], 0  ;;  %s1004_s0 = inlined_call_operand.vmem [shape: bf16[16,32], index: 0, kind: input, shape index: {}]   ;;  %s1005_s1 = inlined_call_operand.hbm [shape: bf16[32,256], index: 1, kind: input, shape index: {}]   ;;  %s1006_s2 = inlined_call_operand.vmem [shape: f32[1,256], index: 2, kind: input, shape index: {}]   ;;  %s1007_s3 = inlined_call_operand.hbm [shape: bf16[256,256], index: 3, kind: input, shape index: {}]   ;;  %s1008_s4 = inlined_call_operand.vmem [shape: f32[1,256], index: 4, kind: input, shape index: {}]   ;;  %s1009_s5 = inlined_call_operand.hbm [shape: bf16[256,128], index: 5, kind: input, shape index: {}]   ;;  %s1010_s6 = inlined_call_operand.vmem [shape: f32[1,128], index: 6, kind: input, shape index: {}]   ;;  %s1011_s7 = inlined_call_operand.vmem [shape: f32[16,128], index: 7, kind: output, shape index: {}]  }
   0x1   :  { %13 = vsyncpa [#allocation5], 0  ;;  %s35_s26 = sshll.u32 %s1007_s3, 4  ;;  %s928_s27 = smov [#allocation4]   ;;  %s36_s26 = int_to_ptr.hbm [resolvable:$true] %s35_s26 }
   0x2   :  { %s37_s28 = sshll.u32 %s928_s27, 4  ;;  %s20_s8 = sshll.u32 %s1005_s1, 4  ;;  %s38_s28 = int_to_ptr.vmem [resolvable:$true] %s37_s28  ;;  %s21_s8 = int_to_ptr.hbm [resolvable:$true] %s20_s8 }
   0x3   :  { %s929_s9 = smov 128   ;;  %s930_s10 = smov 8  }
   0x4   :  { %43 = dma.hbm_to_vmem [thread:$0]  %s36_s26, 4096, %s38_s28, [#allocation5], %s929_s9, %s929_s9, %s930_s10  }
   0x5   :  { %s931_s11 = smov [#allocation2]   ;;  %s50_s15 = sshll.u32 %s1009_s5, 4  ;;  %s51_s15 = int_to_ptr.hbm [resolvable:$true] %s50_s15 }
   0x6   :  { %s22_s12 = sshll.u32 %s931_s11, 4  ;;  %s932_s3 = smov [#allocation6]   ;;  %s23_s12 = int_to_ptr.vmem [resolvable:$true] %s22_s12 }
   0x7   :  { %28 = dma.hbm_to_vmem [thread:$0]  %s21_s8, 512, %s23_s12, [#allocation3], %s929_s9, %s929_s9, %s930_s10  }
   0x8   :  { %s52_s16 = sshll.u32 %s932_s3, 4  ;;  %s933_s17 = smov 64   ;;  %s53_s16 = int_to_ptr.vmem [resolvable:$true] %s52_s16 }
   0x9   :  { %s934_s18 = smov 4  }
   0xa   :  { %58 = dma.hbm_to_vmem [thread:$0]  %s51_s15, 2048, %s53_s16, [#allocation5], %s933_s17, %s933_s17, %s934_s18  }
   0xb   :  { %924 = dma.done.wait [#allocation3], 512  }
   0xc   :  { %925 = vsyncadd [#allocation3], 4294966784 }
   0xd   :  { %926 = dma.done.wait [#allocation5], 6144  }
   0xe   :  { %927 = vsyncadd [#allocation5], 4294961152  ;;  %v591_v0 = vld [vmem:[#allocation2 + $0x10] sm:$0xf]  ;;  %v795_v1 = vld [vmem:[#allocation2 + $0x14] sm:$0xf0] }
   0xf   :  { %v794_v2 = vld [vmem:[#allocation2 + $0x14] sm:$0xf]  ;;  %v592_v3 = vor.u32 %v795_v1, %v591_v0  ;;  %v593_v4 = vld [vmem:[#allocation2 + $0x18] sm:$0xf0]  ;;  %v583_v5 = vld [vmem:[#allocation2] sm:$0xf] }
  0x10   :  { %v793_v6 = vld [vmem:[#allocation2 + $0x4] sm:$0xf0]  ;;  %v596_v7 = vor.u32 %v794_v2, %v593_v4  ;;  %v792_v8 = vld [vmem:[#allocation2 + $0x4] sm:$0xf]  ;;  %v585_v9 = vld [vmem:[#allocation2 + $0x8] sm:$0xf0] }
  0x11   :  { %vm111_vm0 = vcmask 261120   ;;  %121 = vmatpush.bf16.msra.mxu0 %v592_v3  ;;  %v584_v10 = vor.u32 %v793_v6, %v583_v5  ;;  %v657_v11 = vld [vmem:[#allocation4 + $0x70] sm:$0xf]  ;;  %v811_v12 = vld [vmem:[#allocation4 + $0x74] sm:$0xf0]  ;;  %v588_v14 = vor.u32 %v792_v8, %v585_v9  ;;  %v791_v15 = vld [vmem:[%s1004_s0] sm:$0xff] }
  0x12   :  { %v721_v13 = vld [vmem:[#allocation4 + $0xf0] sm:$0xf]  ;;  %135 = vmatpush.bf16.msra.mxu1 %v596_v7  ;;  %v658_v16 = vor.u32 %v811_v12, %v657_v11  ;;  %v827_v17 = vld [vmem:[#allocation4 + $0xf4] sm:$0xf0]  ;;  %v810_v18 = vld [vmem:[#allocation4 + $0x74] sm:$0xf] }
  0x13   :  { %v659_v19 = vld [vmem:[#allocation4 + $0x78] sm:$0xf0]  ;;  %v722_v20 = vor.u32 %v827_v17, %v721_v13  ;;  %v826_v22 = vld [vmem:[#allocation4 + $0xf4] sm:$0xf]  ;;  %v649_v24 = vld [vmem:[#allocation4 + $0x60] sm:$0xf] }
  0x14   :  { %v662_v21 = vor.u32 %v810_v18, %v659_v19  ;;  %v723_v23 = vld [vmem:[#allocation4 + $0xf8] sm:$0xf0]  ;;  %347 = vmatpush.bf16.msra.mxu2 %v658_v16  ;;  %v809_v26 = vld [vmem:[#allocation4 + $0x64] sm:$0xf0]  ;;  %v713_v27 = vld [vmem:[#allocation4 + $0xe0] sm:$0xf] }
  0x15   :  { %v726_v25 = vor.u32 %v826_v22, %v723_v23  ;;  %v825_v28 = vld [vmem:[#allocation4 + $0xe4] sm:$0xf0]  ;;  %122 = vmatpush.bf16.msra.mxu0 %v584_v10  ;;  %361 = vmatpush.bf16.msra.mxu3 %v722_v20  ;;  %v650_v29 = vor.u32 %v809_v26, %v649_v24  ;;  %v808_v31 = vld [vmem:[#allocation4 + $0x64] sm:$0xf]  ;;  %v651_v32 = vld [vmem:[#allocation4 + $0x68] sm:$0xf0] }
  0x16   :  { %v714_v30 = vor.u32 %v825_v28, %v713_v27  ;;  %v824_v33 = vld [vmem:[#allocation4 + $0xe4] sm:$0xf]  ;;  %136 = vmatpush.bf16.msra.mxu1 %v588_v14  ;;  %v654_v34 = vor.u32 %v808_v31, %v651_v32  ;;  %v715_v35 = vld [vmem:[#allocation4 + $0xe8] sm:$0xf0]  ;;  %v641_v36 = vld [vmem:[#allocation4 + $0x50] sm:$0xf] }
  0x17   :  { %v807_v37 = vld [vmem:[#allocation4 + $0x54] sm:$0xf0]  ;;  %v718_v38 = vor.u32 %v824_v33, %v715_v35  ;;  %v705_v39 = vld [vmem:[#allocation4 + $0xd0] sm:$0xf]  ;;  %v806_v41 = vld [vmem:[#allocation4 + $0x54] sm:$0xf] }
  0x18   :  { %v823_v40 = vld [vmem:[#allocation4 + $0xd4] sm:$0xf0]  ;;  %597 = vmatmul.msk.bf16.vlgmr.msra.gmra.mxu0 %vm111_vm0, %v791_v15  ;;  %348 = vmatpush.bf16.msra.mxu2 %v650_v29  ;;  %v642_v42 = vor.u32 %v807_v37, %v641_v36  ;;  %v643_v43 = vld [vmem:[#allocation4 + $0x58] sm:$0xf0]  ;;  %v822_v44 = vld [vmem:[#allocation4 + $0xd4] sm:$0xf] }
  0x19   :  { %375 = vmatpush.bf16.msrb.mxu0 %v662_v21  ;;  %v707_v45 = vld [vmem:[#allocation4 + $0xd8] sm:$0xf0]  ;;  %598 = vmatmul.msk.bf16.vlgmr.msra.gmra.mxu1 %vm111_vm0, %v791_v15  ;;  %v706_v46 = vor.u32 %v823_v40, %v705_v39  ;;  %v633_v47 = vld [vmem:[#allocation4 + $0x40] sm:$0xf]  ;;  %v805_v48 = vld [vmem:[#allocation4 + $0x44] sm:$0xf0]  ;;  %v646_v49 = vor.u32 %v806_v41, %v643_v43 }
  0x1a   :  { %389 = vmatpush.bf16.msrb.mxu1 %v726_v25  ;;  %362 = vmatpush.bf16.msra.mxu3 %v714_v30  ;;  %v697_v50 = vld [vmem:[#allocation4 + $0xc0] sm:$0xf]  ;;  %v821_v51 = vld [vmem:[#allocation4 + $0xc4] sm:$0xf0]  ;;  %v710_v52 = vor.u32 %v822_v44, %v707_v45  ;;  %v804_v53 = vld [vmem:[#allocation4 + $0x44] sm:$0xf]  ;;  %v634_v55 = vor.u32 %v805_v48, %v633_v47 }
  0x1b   :  { %v635_v54 = vld [vmem:[#allocation4 + $0x48] sm:$0xf0]  ;;  %v820_v56 = vld [vmem:[#allocation4 + $0xc4] sm:$0xf]  ;;  %v698_v58 = vor.u32 %v821_v51, %v697_v50  ;;  %v625_v61 = vld [vmem:[#allocation4 + $0x30] sm:$0xf] }
  0x1c   :  { %349 = vmatpush.bf16.msra.mxu2 %v642_v42  ;;  %v699_v57 = vld [vmem:[#allocation4 + $0xc8] sm:$0xf0]  ;;  %v638_v59 = vor.u32 %v804_v53, %v635_v54  ;;  %v803_v62 = vld [vmem:[#allocation4 + $0x34] sm:$0xf0]  ;;  %v689_v63 = vld [vmem:[#allocation4 + $0xb0] sm:$0xf] }
  0x1d   :  { %376 = vmatpush.bf16.msrb.mxu0 %v654_v34  ;;  %v702_v60 = vor.u32 %v820_v56, %v699_v57  ;;  %v626_v0 = vor.u32 %v803_v62, %v625_v61  ;;  %v819_v1 = vld [vmem:[#allocation4 + $0xb4] sm:$0xf0]  ;;  %v802_v2 = vld [vmem:[#allocation4 + $0x34] sm:$0xf]  ;;  %v627_v3 = vld [vmem:[#allocation4 + $0x38] sm:$0xf0] }
  0x1e   :  { %390 = vmatpush.bf16.msrb.mxu1 %v718_v38  ;;  %363 = vmatpush.bf16.msra.mxu3 %v706_v46  ;;  %v690_v4 = vor.u32 %v819_v1, %v689_v63  ;;  %v630_v5 = vor.u32 %v802_v2, %v627_v3  ;;  %v818_v6 = vld [vmem:[#allocation4 + $0xb4] sm:$0xf]  ;;  %v691_v7 = vld [vmem:[#allocation4 + $0xb8] sm:$0xf0]  ;;  %v617_v9 = vld [vmem:[#allocation4 + $0x20] sm:$0xf] }
  0x1f   :  { %v694_v8 = vor.u32 %v818_v6, %v691_v7  ;;  %v801_v10 = vld [vmem:[#allocation4 + $0x24] sm:$0xf0]  ;;  %v681_v12 = vld [vmem:[#allocation4 + $0xa0] sm:$0xf]  ;;  %v800_v14 = vld [vmem:[#allocation4 + $0x24] sm:$0xf] }
  0x20   :  { %350 = vmatpush.bf16.msra.mxu2 %v634_v55  ;;  %v618_v11 = vor.u32 %v801_v10, %v617_v9  ;;  %v817_v13 = vld [vmem:[#allocation4 + $0xa4] sm:$0xf0]  ;;  %v619_v16 = vld [vmem:[#allocation4 + $0x28] sm:$0xf0]  ;;  %v816_v17 = vld [vmem:[#allocation4 + $0xa4] sm:$0xf] }
  0x21   :  { %377 = vmatpush.bf16.msrb.mxu0 %v646_v49  ;;  %v682_v15 = vor.u32 %v817_v13, %v681_v12  ;;  %v683_v18 = vld [vmem:[#allocation4 + $0xa8] sm:$0xf0]  ;;  %v622_v19 = vor.u32 %v800_v14, %v619_v16  ;;  %v609_v21 = vld [vmem:[#allocation4 + $0x10] sm:$0xf]  ;;  %v799_v22 = vld [vmem:[#allocation4 + $0x14] sm:$0xf0] }
  0x22   :  { %391 = vmatpush.bf16.msrb.mxu1 %v710_v52  ;;  %364 = vmatpush.bf16.msra.mxu3 %v698_v58  ;;  %v686_v20 = vor.u32 %v816_v17, %v683_v18  ;;  %v673_v23 = vld [vmem:[#allocation4 + $0x90] sm:$0xf]  ;;  %v610_v24 = vor.u32 %v799_v22, %v609_v21  ;;  %v815_v25 = vld [vmem:[#allocation4 + $0x94] sm:$0xf0]  ;;  %v798_v26 = vld [vmem:[#allocation4 + $0x14] sm:$0xf] }
  0x23   :  { %v611_v27 = vld [vmem:[#allocation4 + $0x18] sm:$0xf0]  ;;  %v674_v28 = vor.u32 %v815_v25, %v673_v23  ;;  %v814_v30 = vld [vmem:[#allocation4 + $0x94] sm:$0xf]  ;;  %v601_v33 = vld [vmem:[#allocation4] sm:$0xf] }
  0x24   :  { %351 = vmatpush.bf16.msra.mxu2 %v626_v0  ;;  %v614_v29 = vor.u32 %v798_v26, %v611_v27  ;;  %v675_v31 = vld [vmem:[#allocation4 + $0x98] sm:$0xf0]  ;;  %v797_v34 = vld [vmem:[#allocation4 + $0x4] sm:$0xf0]  ;;  %v665_v35 = vld [vmem:[#allocation4 + $0x80] sm:$0xf] }
  0x25   :  { %378 = vmatpush.bf16.msrb.mxu0 %v638_v59  ;;  %v678_v32 = vor.u32 %v814_v30, %v675_v31  ;;  %v602_v36 = vor.u32 %v797_v34, %v601_v33  ;;  %v813_v37 = vld [vmem:[#allocation4 + $0x84] sm:$0xf0]  ;;  %v796_v38 = vld [vmem:[#allocation4 + $0x4] sm:$0xf]  ;;  %v603_v39 = vld [vmem:[#allocation4 + $0x8] sm:$0xf0] }
  0x26   :  { %392 = vmatpush.bf16.msrb.mxu1 %v702_v60  ;;  %365 = vmatpush.bf16.msra.mxu3 %v690_v4  ;;  %v666_v40 = vor.u32 %v813_v37, %v665_v35  ;;  %v606_v41 = vor.u32 %v796_v38, %v603_v39  ;;  %v812_v42 = vld [vmem:[#allocation4 + $0x84] sm:$0xf]  ;;  %v667_v43 = vld [vmem:[#allocation4 + $0x88] sm:$0xf0]  ;;  %v843_v45 = vld [vmem:[#allocation6 + $0x78] sm:$0xff] }
  0x27   :  { %v670_v44 = vor.u32 %v812_v42, %v667_v43  ;;  %v835_v46 = vld [vmem:[#allocation6 + $0x38] sm:$0xff]  ;;  %v842_v47 = vld [vmem:[#allocation6 + $0x70] sm:$0xff]  ;;  %v841_v49 = vld [vmem:[#allocation6 + $0x68] sm:$0xff] }
  0x28   :  { %352 = vmatpush.bf16.msra.mxu2 %v618_v11  ;;  %v834_v48 = vld [vmem:[#allocation6 + $0x30] sm:$0xff]  ;;  %v840_v50 = vld [vmem:[#allocation6 + $0x60] sm:$0xff]  ;;  %v833_v4 = vld [vmem:[#allocation6 + $0x28] sm:$0xff] }
  0x29   :  { %379 = vmatpush.bf16.msrb.mxu0 %v630_v5  ;;  %v80_v51 = vld [vmem:[%s1006_s2] sm:$0x3]  ;;  %v839_v5 = vld [vmem:[#allocation6 + $0x58] sm:$0xff]  ;;  %v838_v7 = vld [vmem:[#allocation6 + $0x50] sm:$0xff] }
  0x2a   :  { %393 = vmatpush.bf16.msrb.mxu1 %v694_v8  ;;  %366 = vmatpush.bf16.msra.mxu3 %v682_v15  ;;  %v82_v54 = vperm.slane %v80_v51, 0  ;;  %v83_v55 = vperm.slane %v80_v51, 1  ;;  %v832_v6 = vld [vmem:[#allocation6 + $0x20] sm:$0xff]  ;;  %v831_v8 = vld [vmem:[#allocation6 + $0x18] sm:$0xff]  ;;  %v837_v9 = vld [vmem:[#allocation6 + $0x48] sm:$0xff] }
  0x2b   :  { %v830_v10 = vld [vmem:[#allocation6 + $0x10] sm:$0xff]  ;;  %v836_v11 = vld [vmem:[#allocation6 + $0x40] sm:$0xff]  ;;  %v829_v12 = vld [vmem:[#allocation6 + $0x8] sm:$0xff] }
  0x2c   :  { %353 = vmatpush.bf16.msra.mxu2 %v610_v24  ;;  %v828_v13 = vld [vmem:[#allocation6] sm:$0xff] }
  0x2d   :  { %380 = vmatpush.bf16.msrb.mxu0 %v622_v19  ;;  %v181_v14 = vld [vmem:[%s1008_s4] sm:$0x3] }
  0x2e   :  { %394 = vmatpush.bf16.msrb.mxu1 %v686_v20  ;;  %367 = vmatpush.bf16.msra.mxu3 %v674_v28  ;;  %v184_v16 = vperm.slane %v181_v14, 1  ;;  %v183_v20 = vperm.slane %v181_v14, 0  ;;  %v851_v39 = vld [vmem:[%s1010_s6] ss:$0 sm:$0xff] }
  0x30   :  { %354 = vmatpush.bf16.msra.mxu2 %v602_v36 }
  0x31   :  { %381 = vmatpush.bf16.msrb.mxu0 %v614_v29 }
  0x32   :  { %395 = vmatpush.bf16.msrb.mxu1 %v678_v32  ;;  %368 = vmatpush.bf16.msra.mxu3 %v666_v40 }
  0x34   :  { %541 = vmatpush.bf16.msrb.mxu2 %v835_v46 }
  0x35   :  { %382 = vmatpush.bf16.msrb.mxu0 %v606_v41 }
  0x36   :  { %396 = vmatpush.bf16.msrb.mxu1 %v670_v44  ;;  %555 = vmatpush.bf16.msrb.mxu3 %v843_v45 }
  0x38   :  { %542 = vmatpush.bf16.msrb.mxu2 %v834_v48 }
  0x3a   :  { %556 = vmatpush.bf16.msrb.mxu3 %v842_v47 }
  0x3c   :  { %543 = vmatpush.bf16.msrb.mxu2 %v833_v4 }
  0x3e   :  { %557 = vmatpush.bf16.msrb.mxu3 %v841_v49 }
  0x40   :  { %544 = vmatpush.bf16.msrb.mxu2 %v832_v6 }
  0x42   :  { %558 = vmatpush.bf16.msrb.mxu3 %v840_v50 }
  0x44   :  { %545 = vmatpush.bf16.msrb.mxu2 %v831_v8 }
  0x46   :  { %559 = vmatpush.bf16.msrb.mxu3 %v839_v5 }
  0x48   :  { %546 = vmatpush.bf16.msrb.mxu2 %v830_v10 }
  0x4a   :  { %560 = vmatpush.bf16.msrb.mxu3 %v838_v7 }
  0x4c   :  { %547 = vmatpush.bf16.msrb.mxu2 %v829_v12 }
  0x4e   :  { %561 = vmatpush.bf16.msrb.mxu3 %v837_v9 }
  0x50   :  { %548 = vmatpush.bf16.msrb.mxu2 %v828_v13 }
  0x52   :  { %562 = vmatpush.bf16.msrb.mxu3 %v836_v11 }
  0x95   :  { %v124_v52 = vpop.f32.mrf.mxu0 }
  0x96   :  { %v138_v53 = vpop.f32.mrf.mxu1  ;;  %v125_v56 = vadd.f32 %v124_v52, %v82_v54 }
  0x97   :  { %v139_v57 = vadd.f32 %v138_v53, %v83_v55 }
  0x98   :  { %v143_v62 = vmax.f32 %v125_v56, 0.0 }
  0x99   :  { %v144_v0 = vmax.f32 %v139_v57, 0.0 }
  0x9d   :  { %v126_v58 = vpop.f32.mrf.mxu0 }
  0x9e   :  { %v127_v59 = vadd.f32 %v126_v58, %v82_v54  ;;  %v140_v60 = vpop.f32.mrf.mxu1 }
  0x9f   :  { %v141_v61 = vadd.f32 %v140_v60, %v83_v55 }
  0xa0   :  { %v145_v63 = vmax.f32 %v127_v59, 0.0 }
  0xa1   :  { %v146_v1 = vmax.f32 %v141_v61, 0.0 }
  0xa2   :  { %v147_v2 = vpack.c.bf16 %v145_v63, %v143_v62 }
  0xa3   :  { %v148_v3 = vpack.c.bf16 %v146_v1, %v144_v0 }
  0xa4   :  { %355 = vmatmul.bf16.vlgmr.msra.gmra.mxu2 %v147_v2  ;;  %383 = vmatmul.bf16.vlgmr.msrb.gmra.mxu0 %v147_v2 }
  0xa5   :  { %369 = vmatmul.bf16.vlgmr.msra.gmra.mxu3 %v148_v3  ;;  %397 = vmatmul.bf16.vlgmr.msrb.gmra.mxu1 %v148_v3 }
 0x121   :  { %v384_v15 = vpop.f32.mrf.mxu0 }
 0x122   :  { %v398_v17 = vpop.f32.mrf.mxu1  ;;  %v385_v18 = vadd.f32 %v384_v15, %v184_v16 }
 0x124   :  { %v399_v23 = vadd.f32 %v398_v17, %v385_v18 }
 0x126   :  { %v404_v28 = vmax.f32 %v399_v23, 0.0 }
 0x127   :  { %v356_v19 = vpop.f32.mrf.mxu2 }
 0x128   :  { %v370_v21 = vpop.f32.mrf.mxu3  ;;  %v357_v26 = vadd.f32 %v356_v19, %v183_v20 }
 0x129   :  { %v386_v22 = vpop.f32.mrf.mxu0 }
 0x12a   :  { %v387_v24 = vadd.f32 %v386_v22, %v184_v16  ;;  %v400_v25 = vpop.f32.mrf.mxu1  ;;  %v371_v31 = vadd.f32 %v370_v21, %v357_v26 }
 0x12c   :  { %v401_v27 = vadd.f32 %v400_v25, %v387_v24  ;;  %v403_v36 = vmax.f32 %v371_v31, 0.0 }
 0x12e   :  { %v406_v29 = vmax.f32 %v401_v27, 0.0 }
 0x12f   :  { %v358_v30 = vpop.f32.mrf.mxu2 }
 0x130   :  { %v408_v32 = vpack.c.bf16 %v406_v29, %v404_v28  ;;  %v359_v33 = vadd.f32 %v358_v30, %v183_v20  ;;  %v372_v34 = vpop.f32.mrf.mxu3 }
 0x132   :  { %v373_v35 = vadd.f32 %v372_v34, %v359_v33  ;;  %563 = vmatmul.bf16.vlgmr.msrb.gmra.mxu3 %v408_v32 }
 0x134   :  { %v405_v37 = vmax.f32 %v373_v35, 0.0 }
 0x136   :  { %v407_v38 = vpack.c.bf16 %v405_v37, %v403_v36 }
 0x138   :  { %549 = vmatmul.bf16.vlgmr.msrb.gmra.mxu2 %v407_v38 }
 0x1b5   :  { %v564_v40 = vpop.f32.mrf.mxu3 }
 0x1bb   :  { %v550_v41 = vpop.f32.mrf.mxu2 }
 0x1bc   :  { %v551_v42 = vadd.f32 %v851_v39, %v550_v41 }
 0x1bd   :  { %v566_v46 = vpop.f32.mrf.mxu3 }
 0x1be   :  { %v565_v43 = vadd.f32 %v564_v40, %v551_v42 }
 0x1c0   :  { %569 = vst [vmem:[%s1011_s7] sm:$0xff] %v565_v43 }
 0x1c3   :  { %v552_v44 = vpop.f32.mrf.mxu2 }
 0x1c4   :  { %v553_v45 = vadd.f32 %v851_v39, %v552_v44 }
 0x1c6   :  { %v567_v47 = vadd.f32 %v566_v46, %v553_v45 }
 0x1c8   :  { %570 = vst [vmem:[%s1011_s7 + $0x8] sm:$0xff] %v567_v47 }
 0x1c9   :  { %575 = vsyncpa [#allocation3], 1 }
 0x1ca   :  { %576 = vsyncpa [#allocation5], 1 }

</bundles_post_ra>
